<compile_context>
chip_gen: v7x
topology: tpu7x:2x2x1
jax: 0.10.0
libtpu: 0.0.40
codegen_flags: <defaults>
</compile_context>

<pallas_src>
import math

import jax
import jax.numpy as jnp
from jax.experimental import pallas as pl
from jax.experimental.pallas import tpu as pltpu


_LANE = 128      # lane width (last dim)
_SUBLANE = 8     # f32 sublane count (second-to-last dim)
_TM_MAX = 256    # batch tile (fills the 256-wide MXU on v6e/v7x; fine on v5e)
_TN_MAX = 1024   # output-feature tile


def _round_up(x: int, m: int) -> int:
    return ((x + m - 1) // m) * m


def _cdiv(a: int, b: int) -> int:
    return -(-a // b)


def _choose_out_tiling(out: int, tn_max: int = _TN_MAX):
    """Returns (tn, n_grid, out_alloc) for the final-layer output dimension."""
    if out <= _LANE:
        # Single tiny tile; full-array block (no padding, no post-call slice).
        return out, 1, out
    out_p = _round_up(out, _LANE)                    # lane-dense stores
    # >=2 N-tiles so both v7x TensorCores have work even when batch grid == 1.
    n_grid = max(2, _cdiv(out_p, tn_max))
    tn = _round_up(_cdiv(out_p, n_grid), _LANE)
    return tn, n_grid, tn * n_grid


def _choose_batch_tiling(batch: int, tm_max: int = _TM_MAX):
    """Returns (tm, m_grid, b_pad): tight sublane padding, balanced tiles."""
    b8 = _round_up(max(batch, 1), _SUBLANE)
    m_grid = _cdiv(b8, tm_max)
    tm = _round_up(_cdiv(b8, m_grid), _SUBLANE)
    return tm, m_grid, tm * m_grid


# ---------------------------------------------------------------------------
# Kernel: fused 3-layer MLP   y = relu(relu(x@W1+b1)@W2+b2)@W3 + b3
# One (tm x tn) output tile per grid step; all matmuls hit the MXU with f32
# accumulation; bias + ReLU epilogues run on the VPU in f32.
# ---------------------------------------------------------------------------
def hypernetwork_kernel(x_ref, w1_ref, b1_ref, w2_ref, b2_ref, w3_ref, b3_ref,
                        o_ref):
    wdt = w1_ref.dtype  # weight storage dtype (f32 or bf16)

    h = jnp.dot(x_ref[...].astype(wdt), w1_ref[...],
                preferred_element_type=jnp.float32)
    h = jnp.maximum(h + b1_ref[...], 0.0)
    # TODO(synk): Dropout(0.1) would mask `h` here in training mode.

    h = jnp.dot(h.astype(wdt), w2_ref[...], preferred_element_type=jnp.float32)
    h = jnp.maximum(h + b2_ref[...], 0.0)
    # TODO(synk): Dropout(0.1) would mask `h` here in training mode.

    y = jnp.dot(h.astype(wdt), w3_ref[...], preferred_element_type=jnp.float32)
    o_ref[...] = (y + b3_ref[...]).astype(o_ref.dtype)


# ---------------------------------------------------------------------------
# Parameter init: mirrors the PyTorch module
#   hidden layers: xavier_normal_(gain=1.0), bias = 0
#   final layer:   xavier_normal_(gain=2.0), bias ~ N(0, 1)
# Weights stored transposed as (fan_in, fan_out); only the FINAL layer is
# zero-padded along its output dim (to the N-tile allocation) — the hidden
# dims stay at their true sizes.  Biases stay f32; weights use `param_dtype`
# (f32 default; bf16 recommended for large outputs on v6e/v7x).
# ---------------------------------------------------------------------------
def init_hypernetwork_params(key, context_size, target_param_count,
                             hidden_sizes=(32, 64), param_dtype=jnp.float32):
    sizes = [context_size, *hidden_sizes, target_param_count]
    n_layers = len(sizes) - 1
    keys = jax.random.split(key, 2 * n_layers)
    _, _, out_alloc = _choose_out_tiling(target_param_count)

    params = []
    for li in range(n_layers):
        fan_in, fan_out = sizes[li], sizes[li + 1]
        is_last = li == n_layers - 1
        gain = 2.0 if is_last else 1.0
        std = gain * math.sqrt(2.0 / (fan_in + fan_out))
        w = std * jax.random.normal(keys[2 * li], (fan_in, fan_out),
                                    dtype=jnp.float32)
        if is_last:
            b = jax.random.normal(keys[2 * li + 1], (fan_out,), jnp.float32)
            if out_alloc != fan_out:  # lane/N-tile padding, zero -> inert
                w = jnp.pad(w, ((0, 0), (0, out_alloc - fan_out)))
                b = jnp.pad(b, (0, out_alloc - fan_out))
        else:
            b = jnp.zeros((fan_out,), jnp.float32)
        params.append((w.astype(param_dtype), b.reshape(1, -1)))
    return params


# ---------------------------------------------------------------------------
# Forward wrapper: context (B, context_size) f32 -> (B, target_param_count) f32
# ---------------------------------------------------------------------------
def hypernetwork_forward(params, x, target_param_count):
    (w1, b1), (w2, b2), (w3, b3) = params
    B, ctx = x.shape
    h1 = w1.shape[1]
    h2 = w2.shape[1]
    out_alloc = w3.shape[1]

    tn, n_grid, out_alloc_chk = _choose_out_tiling(target_param_count)
    if out_alloc_chk != out_alloc:
        raise ValueError("params were initialized for a different "
                         "target_param_count tiling")
    tm, m_grid, b_pad = _choose_batch_tiling(B)

    # Pad only the batch dim (true feature width goes straight to the kernel).
    x_p = x if b_pad == B else jnp.pad(x, ((0, b_pad - B), (0, 0)))

    itemsize = jnp.dtype(w1.dtype).itemsize
    flops = 2 * b_pad * (ctx * h1 + h1 * h2 + h2 * out_alloc)
    bytes_accessed = (
        x_p.size * 4
        + (w1.size + w2.size + w3.size) * itemsize
        + (b1.size + b2.size + b3.size) * 4
        + b_pad * out_alloc * 4)

    out_full = pl.pallas_call(
        hypernetwork_kernel,
        out_shape=jax.ShapeDtypeStruct((b_pad, out_alloc), jnp.float32),
        grid_spec=pltpu.PrefetchScalarGridSpec(
            num_scalar_prefetch=0,
            grid=(m_grid, n_grid),
            in_specs=[
                pl.BlockSpec((tm, ctx), lambda i, j: (i, 0)),   # x batch tile
                pl.BlockSpec((ctx, h1), lambda i, j: (0, 0)),   # W1 (resident)
                pl.BlockSpec((1, h1), lambda i, j: (0, 0)),     # b1
                pl.BlockSpec((h1, h2), lambda i, j: (0, 0)),    # W2 (resident)
                pl.BlockSpec((1, h2), lambda i, j: (0, 0)),     # b2
                pl.BlockSpec((h2, tn), lambda i, j: (0, j)),    # W3 N-tile
                pl.BlockSpec((1, tn), lambda i, j: (0, j)),     # b3 N-tile
            ],
            out_specs=pl.BlockSpec((tm, tn), lambda i, j: (i, j)),
        ),
        compiler_params=pltpu.CompilerParams(
            dimension_semantics=("parallel", "parallel"),
            # Tiles are bounded (tm<=256, tn<=1024 -> ~3 MiB double-buffered),
            # comfortably inside v7x's 64 MiB physical VMEM.
            vmem_limit_bytes=32 * 1024 * 1024,
        ),
        cost_estimate=pl.CostEstimate(
            flops=flops, transcendentals=0, bytes_accessed=bytes_accessed),
    )(x_p, w1, b1, w2, b2, w3, b3)

    # Only slice when padding was actually applied.  Padded batch rows contain
    # b3 (bias over zero activations) and padded output columns are exactly 0;
    # both are trimmed here.  Callers that can consume the padded slab should
    # take `out_full` directly to skip this extra pass.
    if b_pad == B and out_alloc == target_param_count:
        return out_full
    return out_full[:B, :target_param_count]


# ---------------------------------------------------------------------------
# Pure-JAX reference of the PyTorch forward (eval mode: Dropout = identity),
# emulating the kernel's mixed-precision scheme exactly.
# ---------------------------------------------------------------------------
def _reference_forward(params, x, target_param_count):
    (w1, b1), (w2, b2), (w3, b3) = params
    wdt = w1.dtype

    def dot(a, b):
        return jnp.dot(a.astype(wdt), b, preferred_element_type=jnp.float32,
                       precision=jax.lax.Precision.HIGHEST)

    h = jnp.maximum(dot(x, w1) + b1, 0.0)
    h = jnp.maximum(dot(h, w2) + b2, 0.0)
    y = dot(h, w3) + b3
    return y[:, :target_param_count]


if __name__ == "__main__":
    key = jax.random.PRNGKey(0)
    k_x1, k_p1, k_x2, k_p2 = jax.random.split(key, 4)

    context_size = 16
    hidden_sizes = (32, 64)

    # --- Test 1: small config (B=8, out=24), f32, single-tile path ------------
    batch1, target1 = 8, 24
    x1 = jax.random.normal(k_x1, (batch1, context_size), dtype=jnp.float32)
    params1 = init_hypernetwork_params(k_p1, context_size, target1, hidden_sizes)
    out1 = jax.block_until_ready(hypernetwork_forward(params1, x1, target1))
    ref1 = _reference_forward(params1, x1, target1)
    assert out1.shape == (batch1, target1)
    assert jnp.allclose(out1, ref1, atol=2e-2, rtol=2e-2)

    # --- Test 2: larger output (B=20, out=1500) -> N-tiled grid + ragged batch
    batch2, target2 = 20, 1500
    x2 = jax.random.normal(k_x2, (batch2, context_size), dtype=jnp.float32)
    params2 = init_hypernetwork_params(k_p2, context_size, target2, hidden_sizes)
    out2 = jax.block_until_ready(hypernetwork_forward(params2, x2, target2))
    ref2 = _reference_forward(params2, x2, target2)
    assert out2.shape == (batch2, target2)
    assert jnp.allclose(out2, ref2, atol=2e-2, rtol=2e-2)

    # --- Test 3: bf16 weight storage (v6e/v7x bandwidth-bound recommendation) -
    params3 = init_hypernetwork_params(k_p2, context_size, target2, hidden_sizes,
                                       param_dtype=jnp.bfloat16)
    out3 = jax.block_until_ready(hypernetwork_forward(params3, x2, target2))
    ref3 = _reference_forward(params3, x2, target2)
    assert out3.shape == (batch2, target2)
    assert bool(jnp.all(jnp.isfinite(out3)))
    assert jnp.allclose(out3, ref3, atol=1e-1, rtol=1e-1)

    print("KERNEL_OK")
</pallas_src>

<mosaic_0001>
module attributes {stable_mosaic.version = 11 : i64} {
  func.func @hypernetwork_kernel(%arg0: i32, %arg1: i32, %arg2: memref<8x16xf32, #tpu.memory_space<vmem>>, %arg3: memref<16x32xf32, #tpu.memory_space<vmem>>, %arg4: memref<1x32xf32, #tpu.memory_space<vmem>>, %arg5: memref<32x64xf32, #tpu.memory_space<vmem>>, %arg6: memref<1x64xf32, #tpu.memory_space<vmem>>, %arg7: memref<64x24xf32, #tpu.memory_space<vmem>>, %arg8: memref<1x24xf32, #tpu.memory_space<vmem>>, %arg9: memref<8x24xf32, #tpu.memory_space<vmem>>) attributes {dimension_semantics = [#tpu.dimension_semantics<parallel>, #tpu.dimension_semantics<parallel>], iteration_bounds = array<i64: 1, 1>, scalar_prefetch = 0 : i64, scratch_operands = 0 : i64, tpu.core_type = #tpu.core_type<tc>, window_params = [{transform_indices = @transform_0, window_bounds = array<i64: 8, 16>}, {pipeline_mode = #tpu.pipeline_mode<synchronous>, transform_indices = @transform_1, window_bounds = array<i64: 16, 32>}, {pipeline_mode = #tpu.pipeline_mode<synchronous>, transform_indices = @transform_2, window_bounds = array<i64: 1, 32>}, {pipeline_mode = #tpu.pipeline_mode<synchronous>, transform_indices = @transform_3, window_bounds = array<i64: 32, 64>}, {pipeline_mode = #tpu.pipeline_mode<synchronous>, transform_indices = @transform_4, window_bounds = array<i64: 1, 64>}, {transform_indices = @transform_5, window_bounds = array<i64: 64, 24>}, {transform_indices = @transform_6, window_bounds = array<i64: 1, 24>}, {transform_indices = @transform_7, window_bounds = array<i64: 8, 24>}]} {
    %c0 = arith.constant 0 : index
    %c0_0 = arith.constant 0 : index
    %0 = vector.load %arg2[%c0, %c0_0] : memref<8x16xf32, #tpu.memory_space<vmem>>, vector<8x16xf32>
    %c0_1 = arith.constant 0 : index
    %c0_2 = arith.constant 0 : index
    %1 = vector.load %arg3[%c0_1, %c0_2] : memref<16x32xf32, #tpu.memory_space<vmem>>, vector<16x32xf32>
    %cst = arith.constant dense<0.000000e+00> : vector<8x32xf32>
    %2 = tpu.matmul %0, %1, %cst {dimension_numbers = #tpu.dot_dimension_numbers<[1], [0], [0], [1], [0, 0, 1, 1], [], []>} : vector<8x16xf32>, vector<16x32xf32>, vector<8x32xf32> -> vector<8x32xf32>
    %c0_3 = arith.constant 0 : index
    %c0_4 = arith.constant 0 : index
    %3 = vector.load %arg4[%c0_3, %c0_4] : memref<1x32xf32, #tpu.memory_space<vmem>>, vector<1x32xf32>
    %4 = vector.broadcast %3 : vector<1x32xf32> to vector<8x32xf32>
    %5 = arith.addf %2, %4 : vector<8x32xf32>
    %cst_5 = arith.constant 0.000000e+00 : f32
    %6 = vector.broadcast %cst_5 : f32 to vector<8x32xf32>
    %7 = arith.maximumf %5, %6 : vector<8x32xf32>
    %c0_6 = arith.constant 0 : index
    %c0_7 = arith.constant 0 : index
    %8 = vector.load %arg5[%c0_6, %c0_7] : memref<32x64xf32, #tpu.memory_space<vmem>>, vector<32x64xf32>
    %cst_8 = arith.constant dense<0.000000e+00> : vector<8x64xf32>
    %9 = tpu.matmul %7, %8, %cst_8 {dimension_numbers = #tpu.dot_dimension_numbers<[1], [0], [0], [1], [0, 0, 1, 1], [], []>} : vector<8x32xf32>, vector<32x64xf32>, vector<8x64xf32> -> vector<8x64xf32>
    %c0_9 = arith.constant 0 : index
    %c0_10 = arith.constant 0 : index
    %10 = vector.load %arg6[%c0_9, %c0_10] : memref<1x64xf32, #tpu.memory_space<vmem>>, vector<1x64xf32>
    %11 = vector.broadcast %10 : vector<1x64xf32> to vector<8x64xf32>
    %12 = arith.addf %9, %11 : vector<8x64xf32>
    %cst_11 = arith.constant 0.000000e+00 : f32
    %13 = vector.broadcast %cst_11 : f32 to vector<8x64xf32>
    %14 = arith.maximumf %12, %13 : vector<8x64xf32>
    %c0_12 = arith.constant 0 : index
    %c0_13 = arith.constant 0 : index
    %15 = vector.load %arg7[%c0_12, %c0_13] : memref<64x24xf32, #tpu.memory_space<vmem>>, vector<64x24xf32>
    %cst_14 = arith.constant dense<0.000000e+00> : vector<8x24xf32>
    %16 = tpu.matmul %14, %15, %cst_14 {dimension_numbers = #tpu.dot_dimension_numbers<[1], [0], [0], [1], [0, 0, 1, 1], [], []>} : vector<8x64xf32>, vector<64x24xf32>, vector<8x24xf32> -> vector<8x24xf32>
    %c0_15 = arith.constant 0 : index
    %c0_16 = arith.constant 0 : index
    %17 = vector.load %arg8[%c0_15, %c0_16] : memref<1x24xf32, #tpu.memory_space<vmem>>, vector<1x24xf32>
    %18 = vector.broadcast %17 : vector<1x24xf32> to vector<8x24xf32>
    %19 = arith.addf %16, %18 : vector<8x24xf32>
    %c0_17 = arith.constant 0 : index
    %c0_18 = arith.constant 0 : index
    %20 = vector.load %arg9[%c0_17, %c0_18] : memref<8x24xf32, #tpu.memory_space<vmem>>, vector<8x24xf32>
    tpu.vector_store %arg9[%c0_17, %c0_18], %19 {strides = array<i32>} : memref<8x24xf32, #tpu.memory_space<vmem>>, vector<8x24xf32>,
    return
  }
  func.func @transform_0(%arg0: i32, %arg1: i32) -> (i32, i32) {
    %c0_i32 = arith.constant 0 : i32
    %c0_i32_0 = arith.constant 0 : i32
    return %arg0, %c0_i32 : i32, i32
  }
  func.func @transform_1(%arg0: i32, %arg1: i32) -> (i32, i32) {
    %c0_i32 = arith.constant 0 : i32
    %c0_i32_0 = arith.constant 0 : i32
    %c0_i32_1 = arith.constant 0 : i32
    return %c0_i32, %c0_i32_0 : i32, i32
  }
  func.func @transform_2(%arg0: i32, %arg1: i32) -> (i32, i32) {
    %c0_i32 = arith.constant 0 : i32
    %c0_i32_0 = arith.constant 0 : i32
    %c0_i32_1 = arith.constant 0 : i32
    return %c0_i32, %c0_i32_0 : i32, i32
  }
  func.func @transform_3(%arg0: i32, %arg1: i32) -> (i32, i32) {
    %c0_i32 = arith.constant 0 : i32
    %c0_i32_0 = arith.constant 0 : i32
    %c0_i32_1 = arith.constant 0 : i32
    return %c0_i32, %c0_i32_0 : i32, i32
  }
  func.func @transform_4(%arg0: i32, %arg1: i32) -> (i32, i32) {
    %c0_i32 = arith.constant 0 : i32
    %c0_i32_0 = arith.constant 0 : i32
    %c0_i32_1 = arith.constant 0 : i32
    return %c0_i32, %c0_i32_0 : i32, i32
  }
  func.func @transform_5(%arg0: i32, %arg1: i32) -> (i32, i32) {
    %c0_i32 = arith.constant 0 : i32
    %c0_i32_0 = arith.constant 0 : i32
    return %c0_i32, %arg1 : i32, i32
  }
  func.func @transform_6(%arg0: i32, %arg1: i32) -> (i32, i32) {
    %c0_i32 = arith.constant 0 : i32
    %c0_i32_0 = arith.constant 0 : i32
    return %c0_i32, %arg1 : i32, i32
  }
  func.func @transform_7(%arg0: i32, %arg1: i32) -> (i32, i32) {
    %c0_i32 = arith.constant 0 : i32
    return %arg0, %arg1 : i32, i32
  }
}

</mosaic_0001>

<bundles_post_ra>
// kernel: tpu_custom_call.1
= control target key start
LH: loop header
LB: loop body
LE: loop exit
PB: predicated region body
PF: predicated region fallthrough
CT: control target
= control target key end

     0   :  { %v412_v2 = vmov 0.0|0.0   ;;  %vm413_vm0 = vmmov 0   ;;  %v414_v4 = vmov 0.0   ;;  %s522_s0 = inlined_call_operand.vmem [shape: f32[8,16], index: 0, kind: input, shape index: {}]   ;;  %s523_s1 = inlined_call_operand.vmem [shape: f32[16,32], index: 1, kind: input, shape index: {}]   ;;  %s524_s2 = inlined_call_operand.vmem [shape: f32[1,32], index: 2, kind: input, shape index: {}]   ;;  %s525_s3 = inlined_call_operand.vmem [shape: f32[32,64], index: 3, kind: input, shape index: {}]   ;;  %s526_s4 = inlined_call_operand.vmem [shape: f32[1,64], index: 4, kind: input, shape index: {}]   ;;  %s527_s5 = inlined_call_operand.vmem [shape: f32[64,24], index: 5, kind: input, shape index: {}]   ;;  %s528_s6 = inlined_call_operand.vmem [shape: f32[1,24], index: 6, kind: input, shape index: {}]   ;;  %s529_s7 = inlined_call_operand.hbm [shape: f32[8,24], index: 7, kind: output, shape index: {}]  }
   0x1   :  { %v28_v0 = vld [vmem:[%s523_s1] sm:$0xff]  ;;  %v29_v1 = vld [vmem:[%s523_s1 + $0x8] sm:$0xff]  ;;  %363 = vmatprep.subr.bf16.mxu1 %v412_v2  ;;  %330 = vmatprep.mubr.msk.f32.mxu1 %vm413_vm0, %v414_v4 }
   0x2   :  { %v364_v3 = vpack.c.bf16 %v29_v1, %v28_v0  ;;  %v112_v5 = vld [vmem:[%s525_s3] sm:$0xff]  ;;  %v113_v6 = vld [vmem:[%s525_s3 + $0x8] sm:$0xff]  ;;  %372 = vmatprep.subr.bf16.mxu0 %v412_v2  ;;  %360 = vmatprep.mubr.msk.f32.mxu0 %vm413_vm0, %v414_v4 }
   0x3   :  { %12 = vsyncpa [#allocation3], 0  ;;  %v27_v7 = vld [vmem:[%s522_s0] sm:$0xff]  ;;  %vm37_vm1 = vcmask 130048   ;;  %v367_v8 = vpack.c.bf16 %v113_v6, %v112_v5  ;;  %v114_v9 = vld [vmem:[%s525_s3 + $0x10] sm:$0xff]  ;;  %vm123_vm2 = vcmask 261120  }
   0x4   :  { %365 = vmatpush3.bf16.msra.mxu1 %v364_v3  ;;  %v115_v10 = vld [vmem:[%s525_s3 + $0x18] sm:$0xff]  ;;  %v198_v12 = vld [vmem:[%s527_s5] sm:$0xff]  ;;  %v199_v13 = vld [vmem:[%s527_s5 + $0x8] sm:$0xff]  ;;  %vm213_vm3 = vcmask 523264   ;;  %s415_s1 = smov [#allocation2]   ;;  %vm287_vm4 = vcmask 195584  }
   0x5   :  { %366 = vmatprep.subr.bf16.mxu1 %v412_v2  ;;  %v370_v11 = vpack.c.bf16 %v115_v10, %v114_v9  ;;  %v200_v14 = vld [vmem:[%s527_s5 + $0x10] sm:$0xff]  ;;  %v373_v15 = vpack.c.bf16 %v199_v13, %v198_v12  ;;  %v201_v16 = vld [vmem:[%s527_s5 + $0x18] sm:$0xff]  ;;  %v202_v18 = vld [vmem:[%s527_s5 + $0x20] sm:$0xff]  ;;  %s295_s10 = sshll.u32 %s415_s1, 4  ;;  %s296_s10 = int_to_ptr.vmem [resolvable:$true] %s295_s10 }
   0x6   :  { %v376_v17 = vpack.c.bf16 %v201_v16, %v200_v14  ;;  %v203_v19 = vld [vmem:[%s527_s5 + $0x28] sm:$0xff]  ;;  %v303_v21 = vld [vmem:[%s524_s2] ss:$0 sm:$0xff]  ;;  %v204_v26 = vld [vmem:[%s527_s5 + $0x30] sm:$0xff]  ;;  %p393_p1 = scmp.lt.s32.totalorder %s296_s10, %s296_s10 }
   0x7   :  { %331 = vmatmul.mubr.msk.f32.vlgmr.msra.gmra.mrb[0].mxu1 %vm37_vm1, %v27_v7  ;;  %374 = vmatpush3.bf16.msra.mxu0 %v373_v15  ;;  %v379_v20 = vpack.c.bf16 %v203_v19, %v202_v18  ;;  %v205_v27 = vld [vmem:[%s527_s5 + $0x38] sm:$0xff]  ;;  %v305_v29 = vld [vmem:[%s526_s4] ss:$0 sm:$0xff]  ;;  %s388_s5 = scalar_lea.vmem %s296_s10, 128 }
   0x8   :  { %368 = vmatpush3.bf16.msra.mxu1 %v367_v8  ;;  %341 = vmatprep.mubr.msk.f32.mxu1 %vm413_vm0, %v414_v4  ;;  %v382_v28 = vpack.c.bf16 %v205_v27, %v204_v26  ;;  %v307_v34 = vld [vmem:[%s528_s6] ss:$0 sm:$0xff]  ;;  %p389_p0 = scmp.ne.s32.totalorder %s296_s10, %s388_s5  ;;  %p394_p2 = scmp.lt.s32.totalorder %s388_s5, %s388_s5 }
   0x9   :  { %369 = vmatprep.subr.bf16.mxu1 %v412_v2  ;;  %375 = vmatprep.subr.bf16.mxu0 %v412_v2 }
   0xa   :  { %p395_p3 = por %p394_p2, %p393_p1 }
   0xb   :  { %377 = vmatpush3.bf16.msra.mxu0 %v376_v17 }
   0xc   :  { %371 = vmatpush3.bf16.msra.mxu1 %v370_v11  ;;  %378 = vmatprep.subr.bf16.mxu0 %v412_v2  ;;  %p396_p4 = pnand %p395_p3, %p389_p0 }
   0xf   :  { %380 = vmatpush3.bf16.msra.mxu0 %v379_v20 }
  0x10   :  { %381 = vmatprep.subr.bf16.mxu0 %v412_v2 }
  0x13   :  { %383 = vmatpush3.bf16.msra.mxu0 %v382_v28 }
  0xda   :  { %v107_v22 = vpop.f32.mrb[0].mxu1 }
  0xdb   :  { %v108_v23 = vadd.f32 %v303_v21, %v107_v22  ;;  %v332_v24 = vpop.f32.mrb[1].mxu1 }
  0xdd   :  { %v111_v25 = vmax.f32 %v108_v23, 0.0 }
  0xdf   :  { %342 = vmatmul.mubr.msk.f32.vlgmr.msra.gmra.mrb[2].mxu1 %vm123_vm2, %v111_v25 }
 0x1b2   :  { %v193_v30 = vpop.f32.mrb[2].mxu1 }
 0x1b3   :  { %v194_v31 = vadd.f32 %v305_v29, %v193_v30  ;;  %v343_v32 = vpop.f32.mrb[3].mxu1 }
 0x1b5   :  { %v197_v33 = vmax.f32 %v194_v31, 0.0 }
 0x1b7   :  { %361 = vmatmul.mubr.msk.f32.vlgmr.msra.gmra.mrb[0].mxu0 %vm213_vm3, %v197_v33 }
 0x28a   :  { %v283_v35 = vpop.f32.mrb[0].mxu0 }
 0x28b   :  { %v284_v36 = vadd.f32 %v307_v34, %v283_v35  ;;  %v362_v37 = vpop.f32.mrb[1].mxu0 }
 0x28d   :  { %288 = vst.msk [vmem:[#allocation2] sm:$0xff] %vm287_vm4, %v284_v36 }
 0x28e   :  { %399 = shalt.err (!%p396_p4)
}
 0x28f   :  { %s400_s12 = scalar_lea.hbm %s529_s7, 128 }
 0x290   :  { %p401_p5 = scmp.ne.s32.totalorder %s529_s7, %s400_s12  ;;  %p404_p6 = scmp.lt.u32.totalorder %s400_s12, %s529_s7 }
 0x292   :  { %p406_p7 = pnand %p404_p6, %p401_p5 }
 0x294   :  { %409 = shalt.err (!%p406_p7)
}
 0x295   :  { %298 = dma.vmem_to_hbm [thread:$0]  %s296_s10, 128, %s529_s7, [#allocation3]  }
 0x296   :  { %410 = dma.done.wait [#allocation3], 128  }
 0x297   :  { %411 = vsyncadd [#allocation3], 4294967168 }
 0x298   :  { %302 = vsyncpa [#allocation3], 1 }

</bundles_post_ra>
